<compile_context>
chip_gen: v5e
topology: v5e:2x2
jax: 0.10.0
libtpu: 0.0.40
codegen_flags: <defaults>
</compile_context>

<pallas_src>
import functools

import jax
import jax.numpy as jnp
from jax import lax
from jax.experimental import pallas as pl
from jax.experimental.pallas import tpu as pltpu


def _hflip_kernel(x_ref, o_ref, *, group_width: int):
    """Reverse every contiguous `group_width`-lane block of the last axis.

    Uses only static rolls (lowered as slice+concatenate), iota and selects.
    A reversal of a power-of-two-wide group is the composition of log2(W)
    "swap adjacent k-blocks" butterfly stages:  out[l] = x[l ^ k].
    Bit-exact for every dtype (no casts, no accumulation).
    """
    x = x_ref[...]                                             # (tile_r, L)
    lane = lax.broadcasted_iota(jnp.int32, x.shape, dimension=x.ndim - 1)
    k = 1
    while k < group_width:
        take_hi = (lane & k) == 0            # bit k clear -> source lane l + k
        from_hi = jnp.roll(x, -k, axis=-1)   # from_hi[l] == x[l + k]
        from_lo = jnp.roll(x, k, axis=-1)    # from_lo[l] == x[l - k]
        x = jnp.where(take_hi, from_hi, from_lo)
        k *= 2
    o_ref[...] = x


def horizontal_flip_index(sample, flip: int = 0):
    """JAX/Pallas equivalent of HorizontalFlipIndex.forward.

    sample: dict with 'trans' (ignored, mirrors PyTorch) and 'image' (N,C,H,W).
    flip:   static Python int (0 or 1), the module's __init__ arg.
    """
    img = sample["image"]

    if not flip:
        # Identity path: never touch the data, never launch a kernel.
        return {"trans": jnp.array([0], dtype=jnp.int32), "image": img}

    trans = jnp.array([1], dtype=jnp.int32)
    N, C, H, W = img.shape

    if W <= 1:
        return {"trans": trans, "image": img}          # flip of width 1 is identity

    if W & (W - 1):
        # TODO(synk): non-power-of-two widths (e.g. 224) fall back to XLA's flip;
        # the butterfly kernel needs a power-of-two group width.
        return {"trans": trans, "image": jnp.flip(img, axis=-1)}

    R = N * C * H
    if W % 128 == 0:
        groups = 1                       # already lane-dense
    elif (128 % W == 0) and (R % (128 // W) == 0):
        groups = 128 // W                # pack `groups` rows into one 128-lane block
    else:
        groups = 1                       # lane-sparse fallback; still correct

    L = groups * W
    Rp = R // groups
    x2d = img.reshape(Rp, L)             # pure row-major reshape: zero-cost packing

    # Row tiling: double-buffered (in + out) tiles stay well under the scoped
    # VMEM limit (~4 MiB per tile -> ~16 MiB live), tile rows a multiple of the
    # dtype's sublane packing.
    itemsize = jnp.dtype(img.dtype).itemsize
    sub_mult = 8 * max(1, 4 // itemsize)             # 8 (f32) / 16 (bf16) / 32 (int8)
    row_bytes = L * itemsize
    tile_r = min(2048, max(sub_mult, (4 * 1024 * 1024) // row_bytes))
    tile_r -= tile_r % sub_mult
    if tile_r >= Rp:
        tile_r = Rp                                   # single full block
    grid = (pl.cdiv(Rp, tile_r),)

    out2d = pl.pallas_call(
        functools.partial(_hflip_kernel, group_width=W),
        out_shape=jax.ShapeDtypeStruct((Rp, L), img.dtype),
        grid=grid,
        in_specs=[pl.BlockSpec((tile_r, L), lambda i: (i, 0))],
        out_specs=pl.BlockSpec((tile_r, L), lambda i: (i, 0)),
        compiler_params=pltpu.CompilerParams(
            dimension_semantics=("parallel",)),
    )(x2d)

    return {"trans": trans, "image": out2d.reshape(N, C, H, W)}


if __name__ == "__main__":
    key = jax.random.PRNGKey(0)
    N, C, H, W = 2, 4, 16, 16
    img = jax.random.normal(key, (N, C, H, W), dtype=jnp.float32)
    sample = {"trans": jnp.array([0], dtype=jnp.int32), "image": img}

    # flip = 1 path (packed lane-dense kernel: W=16 -> 8 rows per 128-lane block)
    out1 = horizontal_flip_index(sample, flip=1)
    jax.block_until_ready(out1["image"])
    assert out1["trans"].tolist() == [1]
    assert jnp.array_equal(out1["image"], jnp.flip(img, axis=-1)), "hflip mismatch"

    # flip = 0 path (identity, no kernel launch)
    out0 = horizontal_flip_index(sample, flip=0)
    jax.block_until_ready(out0["image"])
    assert out0["trans"].tolist() == [0]
    assert jnp.array_equal(out0["image"], img), "identity mismatch"

    # also exercise the W % 128 == 0 (unpacked) kernel path
    img2 = jax.random.normal(jax.random.PRNGKey(0), (1, 2, 8, 128), dtype=jnp.float32)
    out2 = horizontal_flip_index({"trans": jnp.array([0], dtype=jnp.int32),
                                  "image": img2}, flip=1)
    jax.block_until_ready(out2["image"])
    assert jnp.array_equal(out2["image"], jnp.flip(img2, axis=-1)), "wide hflip mismatch"

    print("KERNEL_OK")
</pallas_src>

<mosaic_0001>
module attributes {stable_mosaic.version = 11 : i64} {
  func.func @_hflip_kernel(%arg0: i32, %arg1: memref<16x128xf32, #tpu.memory_space<vmem>>, %arg2: memref<16x128xf32, #tpu.memory_space<vmem>>) attributes {dimension_semantics = [#tpu.dimension_semantics<parallel>], iteration_bounds = array<i64: 1>, scalar_prefetch = 0 : i64, scratch_operands = 0 : i64, tpu.core_type = #tpu.core_type<tc>, window_params = [{transform_indices = @transform_0, window_bounds = array<i64: 16, 128>}, {transform_indices = @transform_1, window_bounds = array<i64: 16, 128>}]} {
    %c0 = arith.constant 0 : index
    %c0_0 = arith.constant 0 : index
    %0 = vector.load %arg1[%c0, %c0_0] : memref<16x128xf32, #tpu.memory_space<vmem>>, vector<16x128xf32>
    %1 = tpu.iota {dimensions = array<i32: 1>} : vector<16x128xi32>
    %c1_i32 = arith.constant 1 : i32
    %2 = vector.broadcast %c1_i32 : i32 to vector<16x128xi32>
    %3 = arith.andi %1, %2 : vector<16x128xi32>
    %c0_i32 = arith.constant 0 : i32
    %4 = vector.broadcast %c0_i32 : i32 to vector<16x128xi32>
    %5 = arith.cmpi eq, %3, %4 : vector<16x128xi32>
    %6 = vector.extract_strided_slice %0 {offsets = [0, 1], sizes = [16, 127], strides = [1, 1]} : vector<16x128xf32> to vector<16x127xf32>
    %7 = vector.extract_strided_slice %0 {offsets = [0, 0], sizes = [16, 1], strides = [1, 1]} : vector<16x128xf32> to vector<16x1xf32>
    %8 = tpu.concatenate %6, %7 in 1 : vector<16x127xf32>, vector<16x1xf32> -> vector<16x128xf32>
    %9 = vector.extract_strided_slice %0 {offsets = [0, 127], sizes = [16, 1], strides = [1, 1]} : vector<16x128xf32> to vector<16x1xf32>
    %10 = vector.extract_strided_slice %0 {offsets = [0, 0], sizes = [16, 127], strides = [1, 1]} : vector<16x128xf32> to vector<16x127xf32>
    %11 = tpu.concatenate %9, %10 in 1 : vector<16x1xf32>, vector<16x127xf32> -> vector<16x128xf32>
    %12 = arith.select %5, %8, %11 : vector<16x128xi1>, vector<16x128xf32>
    %c2_i32 = arith.constant 2 : i32
    %13 = vector.broadcast %c2_i32 : i32 to vector<16x128xi32>
    %14 = arith.andi %1, %13 : vector<16x128xi32>
    %c0_i32_1 = arith.constant 0 : i32
    %15 = vector.broadcast %c0_i32_1 : i32 to vector<16x128xi32>
    %16 = arith.cmpi eq, %14, %15 : vector<16x128xi32>
    %17 = vector.extract_strided_slice %12 {offsets = [0, 2], sizes = [16, 126], strides = [1, 1]} : vector<16x128xf32> to vector<16x126xf32>
    %18 = vector.extract_strided_slice %12 {offsets = [0, 0], sizes = [16, 2], strides = [1, 1]} : vector<16x128xf32> to vector<16x2xf32>
    %19 = tpu.concatenate %17, %18 in 1 : vector<16x126xf32>, vector<16x2xf32> -> vector<16x128xf32>
    %20 = vector.extract_strided_slice %12 {offsets = [0, 126], sizes = [16, 2], strides = [1, 1]} : vector<16x128xf32> to vector<16x2xf32>
    %21 = vector.extract_strided_slice %12 {offsets = [0, 0], sizes = [16, 126], strides = [1, 1]} : vector<16x128xf32> to vector<16x126xf32>
    %22 = tpu.concatenate %20, %21 in 1 : vector<16x2xf32>, vector<16x126xf32> -> vector<16x128xf32>
    %23 = arith.select %16, %19, %22 : vector<16x128xi1>, vector<16x128xf32>
    %c4_i32 = arith.constant 4 : i32
    %24 = vector.broadcast %c4_i32 : i32 to vector<16x128xi32>
    %25 = arith.andi %1, %24 : vector<16x128xi32>
    %c0_i32_2 = arith.constant 0 : i32
    %26 = vector.broadcast %c0_i32_2 : i32 to vector<16x128xi32>
    %27 = arith.cmpi eq, %25, %26 : vector<16x128xi32>
    %28 = vector.extract_strided_slice %23 {offsets = [0, 4], sizes = [16, 124], strides = [1, 1]} : vector<16x128xf32> to vector<16x124xf32>
    %29 = vector.extract_strided_slice %23 {offsets = [0, 0], sizes = [16, 4], strides = [1, 1]} : vector<16x128xf32> to vector<16x4xf32>
    %30 = tpu.concatenate %28, %29 in 1 : vector<16x124xf32>, vector<16x4xf32> -> vector<16x128xf32>
    %31 = vector.extract_strided_slice %23 {offsets = [0, 124], sizes = [16, 4], strides = [1, 1]} : vector<16x128xf32> to vector<16x4xf32>
    %32 = vector.extract_strided_slice %23 {offsets = [0, 0], sizes = [16, 124], strides = [1, 1]} : vector<16x128xf32> to vector<16x124xf32>
    %33 = tpu.concatenate %31, %32 in 1 : vector<16x4xf32>, vector<16x124xf32> -> vector<16x128xf32>
    %34 = arith.select %27, %30, %33 : vector<16x128xi1>, vector<16x128xf32>
    %c8_i32 = arith.constant 8 : i32
    %35 = vector.broadcast %c8_i32 : i32 to vector<16x128xi32>
    %36 = arith.andi %1, %35 : vector<16x128xi32>
    %c0_i32_3 = arith.constant 0 : i32
    %37 = vector.broadcast %c0_i32_3 : i32 to vector<16x128xi32>
    %38 = arith.cmpi eq, %36, %37 : vector<16x128xi32>
    %39 = vector.extract_strided_slice %34 {offsets = [0, 8], sizes = [16, 120], strides = [1, 1]} : vector<16x128xf32> to vector<16x120xf32>
    %40 = vector.extract_strided_slice %34 {offsets = [0, 0], sizes = [16, 8], strides = [1, 1]} : vector<16x128xf32> to vector<16x8xf32>
    %41 = tpu.concatenate %39, %40 in 1 : vector<16x120xf32>, vector<16x8xf32> -> vector<16x128xf32>
    %42 = vector.extract_strided_slice %34 {offsets = [0, 120], sizes = [16, 8], strides = [1, 1]} : vector<16x128xf32> to vector<16x8xf32>
    %43 = vector.extract_strided_slice %34 {offsets = [0, 0], sizes = [16, 120], strides = [1, 1]} : vector<16x128xf32> to vector<16x120xf32>
    %44 = tpu.concatenate %42, %43 in 1 : vector<16x8xf32>, vector<16x120xf32> -> vector<16x128xf32>
    %45 = arith.select %38, %41, %44 : vector<16x128xi1>, vector<16x128xf32>
    %c0_4 = arith.constant 0 : index
    %c0_5 = arith.constant 0 : index
    %46 = vector.load %arg2[%c0_4, %c0_5] : memref<16x128xf32, #tpu.memory_space<vmem>>, vector<16x128xf32>
    tpu.vector_store %arg2[%c0_4, %c0_5], %45 {strides = array<i32>} : memref<16x128xf32, #tpu.memory_space<vmem>>, vector<16x128xf32>,
    return
  }
  func.func @transform_0(%arg0: i32) -> (i32, i32) {
    %c0_i32 = arith.constant 0 : i32
    %c0_i32_0 = arith.constant 0 : i32
    return %arg0, %c0_i32 : i32, i32
  }
  func.func @transform_1(%arg0: i32) -> (i32, i32) {
    %c0_i32 = arith.constant 0 : i32
    %c0_i32_0 = arith.constant 0 : i32
    return %arg0, %c0_i32 : i32, i32
  }
}

</mosaic_0001>

<bundles_post_ra>
// kernel: tpu_custom_call.1
= control target key start
LH: loop header
LB: loop body
LE: loop exit
PB: predicated region body
PF: predicated region fallthrough
CT: control target
= control target key end

     0   :  { %6 = vsyncpa [#allocation3], 0  ;;  %s220_s0 = inlined_call_operand.hbm [shape: f32[16,128], index: 0, kind: input, shape index: {}]   ;;  %s221_s1 = inlined_call_operand.hbm [shape: f32[16,128], index: 1, kind: output, shape index: {}]  }
   0x1   :  { %7 = vsyncpa [#allocation4], 0  ;;  %s12_s8 = sshll.u32 %s220_s0, 4  ;;  %s185_s9 = smov [#allocation2]   ;;  %s13_s8 = int_to_ptr.hbm [resolvable:$true] %s12_s8 }
   0x2   :  { %s14_s10 = sshll.u32 %s185_s9, 4  ;;  %s186_s11 = smov 128   ;;  %s15_s10 = int_to_ptr.vmem [resolvable:$true] %s14_s10 }
   0x3   :  { %s187_s12 = smov 8  }
   0x4   :  { %20 = dma.hbm_to_vmem [thread:$0]  %s13_s8, 256, %s15_s10, [#allocation3], %s186_s11, %s186_s11, %s187_s12  }
   0x5   :  { %181 = dma.done.wait [#allocation3], 256  }
   0x6   :  { %182 = vsyncadd [#allocation3], 4294967040  ;;  %v25_v0 = vld [vmem:[#allocation2] sm:$0xff]  ;;  %s188_s13 = smov 1   ;;  %s189_s14 = smov 127   ;;  %v26_v1 = vld [vmem:[#allocation2 + $0x8] sm:$0xff]  ;;  %v27_v2 = vlaneseq }
   0x7   :  { %39 = vrot.lane.b32.xlu1 %v25_v0, %s188_s13  ;;  %33 = vrot.lane.b32.xlu0 %v25_v0, %s189_s14  ;;  %s190_s0 = smov 2   ;;  %s191_s15 = smov 126  }
   0x8   :  { %v28_v3 = vand.u32 127, %v27_v2  ;;  %s192_s16 = smov 4   ;;  %s193_s17 = smov 124  }
   0x9   :  { %s194_s18 = smov 120   ;;  %s195_s19 = smov [#allocation5]  }
   0xa   :  { %v29_v4 = vand.u32 1, %v28_v3  ;;  %v47_v11 = vand.u32 2, %v28_v3  ;;  %v65_v18 = vand.u32 4, %v28_v3  ;;  %v83_v25 = vand.u32 8, %v28_v3  ;;  %s107_s20 = sshll.u32 %s195_s19, 4  ;;  %s109_s23 = sshll.u32 %s221_s1, 4  ;;  %s108_s20 = int_to_ptr.vmem [resolvable:$true] %s107_s20  ;;  %s110_s23 = int_to_ptr.hbm [resolvable:$true] %s109_s23 }
   0xc   :  { %vm30_vm0 = vcmp.eq.s32.totalorder %v29_v4, 0  ;;  %vm48_vm1 = vcmp.eq.s32.totalorder %v47_v11, 0  ;;  %vm66_vm2 = vcmp.eq.s32.totalorder %v65_v18, 0  ;;  %vm84_vm3 = vcmp.eq.s32.totalorder %v83_v25, 0 }
   0xf   :  { %41 = vrot.lane.b32.xlu1 %v26_v1, %s188_s13  ;;  %35 = vrot.lane.b32.xlu0 %v26_v1, %s189_s14 }
  0x79   :  { %v40_v5 = vpop.permute.xlu1 %39  ;;  %v34_v6 = vpop.permute.xlu0 %33 }
  0x7a   :  { %v45_v7 = vsel %vm30_vm0, %v34_v6, %v40_v5 }
  0x7b   :  { %57 = vrot.lane.b32.xlu0 %v45_v7, %s190_s0  ;;  %51 = vrot.lane.b32.xlu2 %v45_v7, %s191_s15 }
  0x81   :  { %v42_v8 = vpop.permute.xlu1 %41  ;;  %v36_v9 = vpop.permute.xlu0 %35 }
  0x82   :  { %v46_v10 = vsel %vm30_vm0, %v36_v9, %v42_v8 }
  0x83   :  { %59 = vrot.lane.b32.xlu1 %v46_v10, %s190_s0  ;;  %53 = vrot.lane.b32.xlu2 %v46_v10, %s191_s15 }
  0xd5   :  { %v52_v12 = vpop.permute.xlu2 %51 }
  0xdd   :  { %v54_v15 = vpop.permute.xlu2 %53 }
  0xed   :  { %v58_v13 = vpop.permute.xlu0 %57 }
  0xee   :  { %v63_v14 = vsel %vm48_vm1, %v52_v12, %v58_v13 }
  0xef   :  { %75 = vrot.lane.b32.xlu1 %v63_v14, %s192_s16  ;;  %69 = vrot.lane.b32.xlu2 %v63_v14, %s193_s17 }
  0xf5   :  { %v60_v16 = vpop.permute.xlu1 %59 }
  0xf6   :  { %v64_v17 = vsel %vm48_vm1, %v54_v15, %v60_v16 }
  0xf7   :  { %71 = vrot.lane.b32.xlu0 %v64_v17, %s193_s17  ;;  %77 = vrot.lane.b32.xlu2 %v64_v17, %s192_s16 }
 0x149   :  { %v70_v19 = vpop.permute.xlu2 %69 }
 0x151   :  { %v78_v22 = vpop.permute.xlu2 %77 }
 0x161   :  { %v76_v20 = vpop.permute.xlu1 %75 }
 0x162   :  { %v81_v21 = vsel %vm66_vm2, %v70_v19, %v76_v20 }
 0x163   :  { %93 = vrot.lane.b32.xlu2 %v81_v21, %s187_s12  ;;  %87 = vrot.lane.b32.xlu0 %v81_v21, %s194_s18 }
 0x169   :  { %v72_v23 = vpop.permute.xlu0 %71 }
 0x16a   :  { %v82_v24 = vsel %vm66_vm2, %v72_v23, %v78_v22 }
 0x16b   :  { %95 = vrot.lane.b32.xlu0 %v82_v24, %s187_s12  ;;  %89 = vrot.lane.b32.xlu1 %v82_v24, %s194_s18 }
 0x1bd   :  { %v94_v26 = vpop.permute.xlu2 %93 }
 0x1d5   :  { %v88_v27 = vpop.permute.xlu0 %87 }
 0x1d6   :  { %v99_v28 = vsel %vm84_vm3, %v88_v27, %v94_v26 }
 0x1d7   :  { %101 = vst [vmem:[#allocation5] sm:$0xff] %v99_v28 }
 0x1dd   :  { %v90_v29 = vpop.permute.xlu1 %89  ;;  %v96_v30 = vpop.permute.xlu0 %95 }
 0x1de   :  { %v100_v31 = vsel %vm84_vm3, %v90_v29, %v96_v30 }
 0x1df   :  { %102 = vst [vmem:[#allocation5 + $0x8] sm:$0xff] %v100_v31 }
 0x1e0   :  { %115 = dma.vmem_to_hbm [thread:$0]  %s108_s20, 256, %s110_s23, [#allocation4], %s186_s11, %s186_s11, %s187_s12  }
 0x1e1   :  { %183 = dma.done.wait [#allocation4], 256  }
 0x1e2   :  { %184 = vsyncadd [#allocation4], 4294967040 }
 0x1e3   :  { %120 = vsyncpa [#allocation3], 1 }
 0x1e4   :  { %121 = vsyncpa [#allocation4], 1 }

</bundles_post_ra>
